<compile_context>
chip_gen: v7x
topology: tpu7x:2x2x1
jax: 0.10.0
libtpu: 0.0.40
codegen_flags: <defaults>
</compile_context>

<pallas_src>
import functools
import math

import jax
import jax.numpy as jnp
from jax import lax
from jax.experimental import pallas as pl
from jax.experimental.pallas import tpu as pltpu

ALPHA = 0.2          # LeakyReLU negative slope
NEG_BIG = -9e15      # mask value used by the PyTorch module


def _round_up(x, m):
    return (x + m - 1) // m * m


# --------------------- pass 1: projection + attention halves -----------------

def _proj_kernel(feat_ref, w_ref, a1_ref, a2_ref, h_ref, f1_ref, f2_ref):
    # h = features @ W  (MXU, f32 accumulate), computed once per row tile.
    h = jnp.dot(feat_ref[...], w_ref[...], preferred_element_type=jnp.float32)
    f1_ref[...] = jnp.sum(h * a1_ref[...], axis=1, keepdims=True)   # (TQ, 1)
    f2_ref[...] = jnp.sum(h * a2_ref[...], axis=1, keepdims=True)   # (TQ, 1)
    h_ref[...] = h.astype(h_ref.dtype)                              # bf16 store


# --------------------- pass 2: online masked softmax + aggregation -----------

def _attn_kernel(adj_ref, f1_ref, f2_ref, h_ref, out_ref,
                 m_sc, l_sc, acc_sc, *, tk, n_real, n_pad):
    k = pl.program_id(1)

    @pl.when(k == 0)
    def _():
        m_sc[...] = jnp.full_like(m_sc, NEG_BIG)   # matches -9e15 mask semantics
        l_sc[...] = jnp.zeros_like(l_sc)
        acc_sc[...] = jnp.zeros_like(acc_sc)

    # e[i,j] = leakyrelu(f1[i] + f2[j]) for this (TQ, TK) block.
    # f2 is a precomputed (1, TK) lane-row -> pure VPU adds, no per-step transpose.
    e = f1_ref[...] + f2_ref[...]                              # (TQ, TK)
    e = jnp.where(e > 0, e, ALPHA * e)                         # LeakyReLU

    adj = adj_ref[...].astype(jnp.float32)                     # int8 stream
    if n_pad > n_real:
        # padded columns get -inf so they are exactly excluded from the softmax
        col = k * tk + lax.broadcasted_iota(jnp.int32, e.shape, 1)
        fill = jnp.where(col < n_real, NEG_BIG, -jnp.inf)
        e = jnp.where(adj > 0, e, fill)
    else:
        e = jnp.where(adj > 0, e, NEG_BIG)

    # Online softmax update (flash-style).
    m_prev = m_sc[...]
    m_new = jnp.maximum(m_prev, jnp.max(e, axis=1, keepdims=True))
    scale = jnp.exp(m_prev - m_new)
    p = jnp.exp(e - m_new)
    l_sc[...] = scale * l_sc[...] + jnp.sum(p, axis=1, keepdims=True)
    acc_sc[...] = scale * acc_sc[...] + jnp.dot(
        p.astype(h_ref.dtype), h_ref[...], preferred_element_type=jnp.float32)
    m_sc[...] = m_new

    @pl.when(k == pl.num_programs(1) - 1)
    def _():
        hp = acc_sc[...] * pl.reciprocal(l_sc[...], approx=True)
        out_ref[...] = jnp.where(hp > 0, hp, jnp.exp(hp) - 1.0)   # ELU


# --------------------------------- wrapper -----------------------------------

def graph_attention_layer(adj, features, w, a1, a2, *, tq=256, tk=512):
    """GAT forward.  adj: (N,N) (entries > 0 are edges), features: (N,F_in),
    w: (F_in,F_out) (= nn.Linear weight transposed), a1/a2: (1,F_out).
    tq/tk: row / neighbor tile sizes.  v6e/v7x: 256/512.  v5e: 128/128."""
    N, f_in = features.shape
    f_out = w.shape[1]
    f32 = jnp.float32

    fp = _round_up(max(f_out, 128), 128)            # lane-dense feature width
    n_pad = _round_up(N, math.lcm(tq, tk))
    n_row, n_col = n_pad // tq, n_pad // tk

    # Pad inputs (zero features / masked adjacency / zero attention weights).
    feat_p = jnp.zeros((n_pad, f_in), f32).at[:N].set(features.astype(f32))
    adj_p = jnp.zeros((n_pad, n_pad), jnp.int8).at[:N, :N].set(
        (adj > 0).astype(jnp.int8))
    w_p = jnp.zeros((f_in, fp), f32).at[:, :f_out].set(w.astype(f32))
    a1_p = jnp.zeros((1, fp), f32).at[:, :f_out].set(a1.astype(f32))
    a2_p = jnp.zeros((1, fp), f32).at[:, :f_out].set(a2.astype(f32))

    # ---- pass 1: h (bf16), f1, f2 ----
    h, f1, f2 = pl.pallas_call(
        _proj_kernel,
        out_shape=(jax.ShapeDtypeStruct((n_pad, fp), jnp.bfloat16),
                   jax.ShapeDtypeStruct((n_pad, 1), f32),
                   jax.ShapeDtypeStruct((n_pad, 1), f32)),
        grid_spec=pltpu.PrefetchScalarGridSpec(
            num_scalar_prefetch=0,
            grid=(n_row,),
            in_specs=[pl.BlockSpec((tq, f_in), lambda i: (i, 0)),
                      pl.BlockSpec((f_in, fp), lambda i: (0, 0)),
                      pl.BlockSpec((1, fp), lambda i: (0, 0)),
                      pl.BlockSpec((1, fp), lambda i: (0, 0))],
            out_specs=[pl.BlockSpec((tq, fp), lambda i: (i, 0)),
                       pl.BlockSpec((tq, 1), lambda i: (i, 0)),
                       pl.BlockSpec((tq, 1), lambda i: (i, 0))]),
        compiler_params=pltpu.CompilerParams(
            dimension_semantics=("parallel",)),
    )(feat_p, w_p, a1_p, a2_p)

    # Hoisted once (outside the hot loop): present f2 as a (1, N_pad) lane row.
    f2_row = f2.reshape(1, n_pad)

    # ---- pass 2: tiled online-softmax attention + aggregation ----
    kern = functools.partial(_attn_kernel, tk=tk, n_real=N, n_pad=n_pad)
    cost = pl.CostEstimate(
        flops=2 * n_pad * n_pad * fp + 8 * n_pad * n_pad,
        transcendentals=n_pad * n_pad,
        bytes_accessed=n_pad * n_pad                       # int8 adjacency
        + n_row * n_pad * fp * 2                           # h re-read per row tile
        + n_pad * fp * 4)                                  # output

    out = pl.pallas_call(
        kern,
        out_shape=jax.ShapeDtypeStruct((n_pad, fp), f32),
        grid_spec=pltpu.PrefetchScalarGridSpec(
            num_scalar_prefetch=0,
            grid=(n_row, n_col),
            in_specs=[pl.BlockSpec((tq, tk), lambda i, k: (i, k)),   # adj (int8)
                      pl.BlockSpec((tq, 1), lambda i, k: (i, 0)),    # f1
                      pl.BlockSpec((1, tk), lambda i, k: (0, k)),    # f2 row
                      pl.BlockSpec((tk, fp), lambda i, k: (k, 0))],  # h (bf16)
            out_specs=pl.BlockSpec((tq, fp), lambda i, k: (i, 0)),
            scratch_shapes=[pltpu.VMEM((tq, 1), f32),     # running max m
                            pltpu.VMEM((tq, 1), f32),     # running sum l
                            pltpu.VMEM((tq, fp), f32)]),  # accumulator
        compiler_params=pltpu.CompilerParams(
            dimension_semantics=("parallel", "arbitrary"),
            # Actual buffer budget at defaults is ~3 MiB; 32 MiB leaves
            # double-buffer headroom and fits v7x's 64 MiB physical VMEM.
            vmem_limit_bytes=32 * 1024 * 1024),
        cost_estimate=cost,
    )(adj_p, f1, f2_row, h)

    return out[:N, :f_out]


# --------------------------------- reference ----------------------------------

def reference(adj, features, w, a1, a2):
    h = features @ w
    e = (h * a1).sum(1, keepdims=True) + (h * a2).sum(1, keepdims=True).T
    e = jnp.where(e > 0, e, ALPHA * e)
    e = jnp.where(adj > 0, e, NEG_BIG)
    att = jax.nn.softmax(e, axis=1)
    hp = att @ h
    return jnp.where(hp > 0, hp, jnp.exp(hp) - 1.0)


if __name__ == "__main__":
    N, F_IN, F_OUT = 300, 48, 16   # N not a tile multiple -> exercises padding

    key = jax.random.PRNGKey(0)
    k_feat, k_adj, k_w, k_a = jax.random.split(key, 4)

    features = jax.random.normal(k_feat, (N, F_IN), dtype=jnp.float32)
    adj = (jax.random.uniform(k_adj, (N, N)) > 0.6).astype(jnp.float32)
    adj = jnp.maximum(adj, jnp.eye(N, dtype=jnp.float32))   # self loops

    # nn.Linear(F_IN, F_OUT, bias=False): weight (F_OUT, F_IN); store W = weight.T
    w = jax.random.normal(k_w, (F_IN, F_OUT), dtype=jnp.float32) * 0.1
    attn = jax.random.normal(k_a, (2 * F_OUT, 1), dtype=jnp.float32) * 0.2
    a1 = attn[:F_OUT, 0].reshape(1, F_OUT)
    a2 = attn[F_OUT:, 0].reshape(1, F_OUT)

    # Small tiles for the small demo graph (grid (3,3)); defaults (256/512)
    # are the v6e/v7x production choice.
    out = graph_attention_layer(adj, features, w, a1, a2, tq=128, tk=128)
    out = jax.block_until_ready(out)

    ref = reference(adj, features, w, a1, a2)
    assert out.shape == (N, F_OUT)
    # bf16 aggregation + approx reciprocal -> tolerance ~1e-2.
    err = float(jnp.max(jnp.abs(out - ref)))
    assert jnp.allclose(out, ref, rtol=2e-2, atol=2e-2), f"mismatch vs reference: {err}"

    print("KERNEL_OK")
</pallas_src>

<mosaic_0001>
module attributes {stable_mosaic.version = 11 : i64} {
  func.func @_proj_kernel(%arg0: i32, %arg1: memref<128x48xf32, #tpu.memory_space<vmem>>, %arg2: memref<48x128xf32, #tpu.memory_space<vmem>>, %arg3: memref<1x128xf32, #tpu.memory_space<vmem>>, %arg4: memref<1x128xf32, #tpu.memory_space<vmem>>, %arg5: memref<128x128xbf16, #tpu.memory_space<vmem>>, %arg6: memref<128x1xf32, #tpu.memory_space<vmem>>, %arg7: memref<128x1xf32, #tpu.memory_space<vmem>>) attributes {dimension_semantics = [#tpu.dimension_semantics<parallel>], iteration_bounds = array<i64: 3>, scalar_prefetch = 0 : i64, scratch_operands = 0 : i64, tpu.core_type = #tpu.core_type<tc>, window_params = [{transform_indices = @transform_0, window_bounds = array<i64: 128, 48>}, {pipeline_mode = #tpu.pipeline_mode<synchronous>, transform_indices = @transform_1, window_bounds = array<i64: 48, 128>}, {pipeline_mode = #tpu.pipeline_mode<synchronous>, transform_indices = @transform_2, window_bounds = array<i64: 1, 128>}, {pipeline_mode = #tpu.pipeline_mode<synchronous>, transform_indices = @transform_3, window_bounds = array<i64: 1, 128>}, {transform_indices = @transform_4, window_bounds = array<i64: 128, 128>}, {transform_indices = @transform_5, window_bounds = array<i64: 128, 1>}, {transform_indices = @transform_6, window_bounds = array<i64: 128, 1>}]} {
    %c0 = arith.constant 0 : index
    %c0_0 = arith.constant 0 : index
    %0 = vector.load %arg1[%c0, %c0_0] : memref<128x48xf32, #tpu.memory_space<vmem>>, vector<128x48xf32>
    %c0_1 = arith.constant 0 : index
    %c0_2 = arith.constant 0 : index
    %1 = vector.load %arg2[%c0_1, %c0_2] : memref<48x128xf32, #tpu.memory_space<vmem>>, vector<48x128xf32>
    %cst = arith.constant dense<0.000000e+00> : vector<128x128xf32>
    %2 = tpu.matmul %0, %1, %cst {dimension_numbers = #tpu.dot_dimension_numbers<[1], [0], [0], [1], [0, 0, 1, 1], [], []>} : vector<128x48xf32>, vector<48x128xf32>, vector<128x128xf32> -> vector<128x128xf32>
    %c0_3 = arith.constant 0 : index
    %c0_4 = arith.constant 0 : index
    %3 = vector.load %arg3[%c0_3, %c0_4] : memref<1x128xf32, #tpu.memory_space<vmem>>, vector<1x128xf32>
    %4 = vector.broadcast %3 : vector<1x128xf32> to vector<128x128xf32>
    %5 = arith.mulf %2, %4 : vector<128x128xf32>
    %cst_5 = arith.constant dense<0.000000e+00> : vector<128xf32>
    %6 = vector.multi_reduction <add>, %5, %cst_5 [1] : vector<128x128xf32> to vector<128xf32>
    %7 = vector.shape_cast %6 : vector<128xf32> to vector<128x1xf32>
    %c0_6 = arith.constant 0 : index
    %c0_7 = arith.constant 0 : index
    %8 = vector.load %arg6[%c0_6, %c0_7] : memref<128x1xf32, #tpu.memory_space<vmem>>, vector<128x1xf32>
    tpu.vector_store %arg6[%c0_6, %c0_7], %7 {strides = array<i32>} : memref<128x1xf32, #tpu.memory_space<vmem>>, vector<128x1xf32>,
    %c0_8 = arith.constant 0 : index
    %c0_9 = arith.constant 0 : index
    %9 = vector.load %arg4[%c0_8, %c0_9] : memref<1x128xf32, #tpu.memory_space<vmem>>, vector<1x128xf32>
    %10 = vector.broadcast %9 : vector<1x128xf32> to vector<128x128xf32>
    %11 = arith.mulf %2, %10 : vector<128x128xf32>
    %cst_10 = arith.constant dense<0.000000e+00> : vector<128xf32>
    %12 = vector.multi_reduction <add>, %11, %cst_10 [1] : vector<128x128xf32> to vector<128xf32>
    %13 = vector.shape_cast %12 : vector<128xf32> to vector<128x1xf32>
    %c0_11 = arith.constant 0 : index
    %c0_12 = arith.constant 0 : index
    %14 = vector.load %arg7[%c0_11, %c0_12] : memref<128x1xf32, #tpu.memory_space<vmem>>, vector<128x1xf32>
    tpu.vector_store %arg7[%c0_11, %c0_12], %13 {strides = array<i32>} : memref<128x1xf32, #tpu.memory_space<vmem>>, vector<128x1xf32>,
    %15 = arith.truncf %2 : vector<128x128xf32> to vector<128x128xbf16>
    %c0_13 = arith.constant 0 : index
    %c0_14 = arith.constant 0 : index
    %16 = vector.load %arg5[%c0_13, %c0_14] : memref<128x128xbf16, #tpu.memory_space<vmem>>, vector<128x128xbf16>
    tpu.vector_store %arg5[%c0_13, %c0_14], %15 {strides = array<i32>} : memref<128x128xbf16, #tpu.memory_space<vmem>>, vector<128x128xbf16>,
    return
  }
  func.func @transform_0(%arg0: i32) -> (i32, i32) {
    %c0_i32 = arith.constant 0 : i32
    %c0_i32_0 = arith.constant 0 : i32
    return %arg0, %c0_i32 : i32, i32
  }
  func.func @transform_1(%arg0: i32) -> (i32, i32) {
    %c0_i32 = arith.constant 0 : i32
    %c0_i32_0 = arith.constant 0 : i32
    %c0_i32_1 = arith.constant 0 : i32
    return %c0_i32, %c0_i32_0 : i32, i32
  }
  func.func @transform_2(%arg0: i32) -> (i32, i32) {
    %c0_i32 = arith.constant 0 : i32
    %c0_i32_0 = arith.constant 0 : i32
    %c0_i32_1 = arith.constant 0 : i32
    return %c0_i32, %c0_i32_0 : i32, i32
  }
  func.func @transform_3(%arg0: i32) -> (i32, i32) {
    %c0_i32 = arith.constant 0 : i32
    %c0_i32_0 = arith.constant 0 : i32
    %c0_i32_1 = arith.constant 0 : i32
    return %c0_i32, %c0_i32_0 : i32, i32
  }
  func.func @transform_4(%arg0: i32) -> (i32, i32) {
    %c0_i32 = arith.constant 0 : i32
    %c0_i32_0 = arith.constant 0 : i32
    return %arg0, %c0_i32 : i32, i32
  }
  func.func @transform_5(%arg0: i32) -> (i32, i32) {
    %c0_i32 = arith.constant 0 : i32
    %c0_i32_0 = arith.constant 0 : i32
    return %arg0, %c0_i32 : i32, i32
  }
  func.func @transform_6(%arg0: i32) -> (i32, i32) {
    %c0_i32 = arith.constant 0 : i32
    %c0_i32_0 = arith.constant 0 : i32
    return %arg0, %c0_i32 : i32, i32
  }
}

</mosaic_0001>

<bundles_post_ra>
// kernel: tpu_custom_call.1
= control target key start
LH: loop header
LB: loop body
LE: loop exit
PB: predicated region body
PF: predicated region fallthrough
CT: control target
= control target key end

     0   :  { %12 = vsyncpa [#allocation3], 0  ;;  %s1486_s0 = inlined_call_operand.vmem [shape: f32[384,48], index: 0, kind: input, shape index: {}]   ;;  %s1487_s1 = inlined_call_operand.vmem [shape: f32[48,128], index: 1, kind: input, shape index: {}]   ;;  %s1488_s2 = inlined_call_operand.vmem [shape: f32[1,128], index: 2, kind: input, shape index: {}]   ;;  %s1489_s3 = inlined_call_operand.vmem [shape: f32[1,128], index: 3, kind: input, shape index: {}]   ;;  %s1490_s4 = inlined_call_operand.hbm [shape: bf16[384,128], index: 4, kind: output, shape index: {0}]   ;;  %s1491_s5 = inlined_call_operand.vmem [shape: f32[384,1], index: 5, kind: output, shape index: {1}]   ;;  %s1492_s6 = inlined_call_operand.vmem [shape: f32[384,1], index: 6, kind: output, shape index: {2}]  }
   0x1   :  { %14 = vsyncpa [#allocation3 + $0x1], 0  ;;  %s1196_s21 = smov 0   ;;  %s1198_s22 = smov 0  }
   0x2   :  { %s1200_s23 = smov 0   ;;  %s1202_s24 = smov 0  }
   0x3 LB: > { %s1217_s25 = sadd.s32 4294967295, %s1156_s24   ;;  %s863_s26 = sadd.s32 4294967294, %s1156_s24   ;;  %s1156_s24 = sphi %s1202_s24, %s1498_s24   ;;  %s1152_s23 = sphi %s1200_s23, %s1497_s23   ;;  %s1148_s22 = sphi %s1198_s22, %s1496_s22   ;;  %s1144_s21 = sphi %s1196_s21, %s1495_s21  }
   0x4   : > { %s1221_s27 = sadd.s32 1, %s1156_s24   ;;  %s116_s28 = sadd.s32 1, %s1152_s23 }
   0x5   : > { %s113_s29 = ssub.s32 %s1156_s24, %s1221_s27  ;;  %p126_p0 = scmp.ne.s32.totalorder %s1152_s23, %s1148_s22 }
   0x6   : > { %p114_p1 = scmp.eq.s32.totalorder %s113_s29, 0  ;;  %p127_p2 = scmp.eq.s32.totalorder %s1217_s25, 2 }
   0x7   : > { %p132_p3 = scmp.ne.s32.totalorder %s1148_s22, %s1144_s21  ;;  %p133_p4 = scmp.eq.s32.totalorder %s863_s26, 2 }
   0x8   : > { %s1232_s30 = scalar_select %p114_p1, %s1152_s23, %s116_s28  }
   0x9   : > { %p1234_p5 = por %p127_p2, %p126_p0  ;;  %p1238_p6 = por %p133_p4, %p132_p3 }
   0xa   : > { %p866_p7 = scmp.ge.s32.totalorder %s1156_s24, 1  ;;  %p221_p8 = scmp.lt.s32.totalorder %s1156_s24, 4 }
   0xc   : > { %p222_p9 = pnand %p866_p7, %p221_p8 }
   0xd   : > { %v296_v0 = vld [vmem:[%s1487_s1] sm:$0xff] (!%p222_p9)  ;;  %v297_v1 = vld [vmem:[%s1487_s1 + $0x8] sm:$0xff] (!%p222_p9)  ;;  %v298_v2 = vld [vmem:[%s1487_s1 + $0x10] sm:$0xff] (!%p222_p9)  ;;  %s868_s15 = sshll.u32 (!%p222_p9), %s1217_s25, 4  ;;  %vm302_vm0 = vcmask (!%p222_p9), 392192   ;;  %s244_s11 = sand.u32 (!%p222_p9), 1, %s1148_s22  }
   0xe   : > { %225 = sbr.rel (%p222_p9) target bundleno = 446 (0x1be), region = 36  ;;  %v1035_v3 = vpack.c.bf16 (!%p222_p9), %v297_v1, %v296_v0  ;;  %v299_v4 = vld [vmem:[%s1487_s1 + $0x18] sm:$0xff] (!%p222_p9)  ;;  %p262_p10 = scmp.lt.s32.totalorder (!%p222_p9), %s868_s15, 47  ;;  %v300_v6 = vld [vmem:[%s1487_s1 + $0x20] sm:$0xff] (!%p222_p9)  ;;  %v301_v7 = vld [vmem:[%s1487_s1 + $0x28] sm:$0xff] (!%p222_p9) }
   0xf   : > { %v1039_v5 = vpack.c.bf16 (!%p222_p9), %v299_v4, %v298_v2  ;;  %v1043_v8 = vpack.c.bf16 (!%p222_p9), %v301_v7, %v300_v6  ;;  %s867_s12 = sshll.u32 (!%p222_p9), %s244_s11, 6  ;;  %v1309_v25 = vld [vmem:[%s1488_s2] ss:$0 sm:$0xff] (!%p222_p9)  ;;  %s929_s18 = sshll.u32 (!%p222_p9), %s1217_s25, 10 }
  0x10   : > { %1036 = vmatprep.subr.bf16.mxu0 (!%p222_p9), %v1035_v3  ;;  %1047 = vmatprep.subr.bf16.mxu1 (!%p222_p9), %v1035_v3  ;;  %v1316_v34 = vld [vmem:[%s1489_s3] ss:$0 sm:$0xff] (!%p222_p9)  ;;  %s1318_s17 = scalar_lea.vmem (!%p222_p9), [#allocation2], %s867_s12  ;;  %s1363_s29 = scalar_lea.hbm (!%p222_p9), %s1490_s4, %s929_s18 }
  0x11   : > { %1038 = vmatpush3.bf16.msra.mxu0 (!%p222_p9), %v1035_v3  ;;  %1050 = vmatpush3.bf16.msra.mxu1 (!%p222_p9), %v1035_v3  ;;  %s743_s19 = sshll.u32 (!%p222_p9), %s1318_s17, 4  ;;  %s1369_s9 = scalar_lea.sflag (!%p222_p9), [#allocation3], %s244_s11  ;;  %s1365_s19 = int_to_ptr.vmem [resolvable:$true] %s743_s19 }
  0x12   : > { %1040 = vmatprep.subr.bf16.mxu0 (!%p222_p9), %v1039_v5  ;;  %1048 = vmatprep.subr.bf16.mxu1 (!%p222_p9), %v1039_v5  ;;  %s1158_s25 = smov (!%p222_p9), [#allocation2]  }
  0x13   : > { %s1098_s12 = sshll.u32 (!%p222_p9), %s1158_s25, 4  ;;  %s1099_s12 = int_to_ptr.vmem [resolvable:$false] %s1098_s12 }
  0x14   : > { %s1100_s13 = scalar_lea.vmem (!%p222_p9), %s1099_s12, 2048  ;;  %p1101_p0 = scmp.lt.s32.totalorder (!%p222_p9), %s1365_s19, %s1099_s12 }
  0x15   : > { %s1500_s15 = smov (!%p262_p10, %s868_s15), 47  ;;  %1042 = vmatpush3.bf16.msra.mxu0 %v1039_v5  ;;  %1051 = vmatpush3.bf16.msra.mxu1 %v1039_v5 }
  0x16   : > { %s1263_s28 = sshll.u32 %s1500_s15, 3  ;;  %1044 = vmatprep.subr.bf16.mxu0 %v1043_v8  ;;  %1049 = vmatprep.subr.bf16.mxu1 %v1043_v8 }
  0x17   : > { %s1269_s10 = scalar_lea.vmem %s1486_s0, %s1263_s28 }
  0x18   : > { %v280_v9 = vld [vmem:[%s1269_s10] sm:$0xff]  ;;  %v281_v11 = vld [vmem:[%s1269_s10 + $0x8] sm:$0xff]  ;;  %v282_v13 = vld [vmem:[%s1269_s10 + $0x10] sm:$0xff] }
  0x19   : > { %v288_v10 = vld [vmem:[%s1269_s10 + $0x40] sm:$0xff]  ;;  %1011 = vmatprep.mubr.msk.f32.mxu0 %vm302_vm0, %v280_v9  ;;  %1046 = vmatpush3.bf16.msra.mxu0 %v1043_v8  ;;  %v289_v12 = vld [vmem:[%s1269_s10 + $0x48] sm:$0xff]  ;;  %v290_v14 = vld [vmem:[%s1269_s10 + $0x50] sm:$0xff] }
  0x1a   : > { %1023 = vmatprep.mubr.msk.f32.mxu1 %vm302_vm0, %v288_v10  ;;  %1052 = vmatpush3.bf16.msra.mxu1 %v1043_v8  ;;  %v283_v15 = vld [vmem:[%s1269_s10 + $0x18] sm:$0xff]  ;;  %v284_v17 = vld [vmem:[%s1269_s10 + $0x20] sm:$0xff]  ;;  %v285_v19 = vld [vmem:[%s1269_s10 + $0x28] sm:$0xff] }
  0x1b   : > { %v291_v16 = vld [vmem:[%s1269_s10 + $0x58] sm:$0xff]  ;;  %v292_v18 = vld [vmem:[%s1269_s10 + $0x60] sm:$0xff]  ;;  %v293_v20 = vld [vmem:[%s1269_s10 + $0x68] sm:$0xff] }
  0x1c   : > { %1012 = vmatmul.mubr.msk.f32.vlgmr.msra.gmra.mrb[0].mxu0 %vm302_vm0, %v281_v11  ;;  %v286_v21 = vld [vmem:[%s1269_s10 + $0x30] sm:$0xff]  ;;  %v287_v23 = vld [vmem:[%s1269_s10 + $0x38] sm:$0xff] }
  0x1d   : > { %1024 = vmatmul.mubr.msk.f32.vlgmr.msra.gmra.mrb[0].mxu1 %vm302_vm0, %v289_v12  ;;  %1014 = vmatprep.mubr.msk.f32.mxu0 %vm302_vm0, %v282_v13  ;;  %v294_v22 = vld [vmem:[%s1269_s10 + $0x70] sm:$0xff]  ;;  %v295_v24 = vld [vmem:[%s1269_s10 + $0x78] sm:$0xff]  ;;  %s1094_s10 = scalar_lea.vmem %s1365_s19, 1024 }
  0x1e   : > { %1026 = vmatprep.mubr.msk.f32.mxu1 %vm302_vm0, %v290_v14  ;;  %p1095_p11 = scmp.ne.s32.totalorder %s1365_s19, %s1094_s10  ;;  %p1102_p1 = scmp.lt.s32.totalorder %s1100_s13, %s1094_s10 }
  0x20   : > { %1015 = vmatmul.mubr.msk.f32.gmra.mrb[2].mxu0 %vm302_vm0, %v283_v15  ;;  %p1096_p12 = pnand %p1095_p11, %p1234_p5  ;;  %p1103_p2 = por %p1102_p1, %p1101_p0 }
  0x21   : > { %1027 = vmatmul.mubr.msk.f32.gmra.mrb[2].mxu1 %vm302_vm0, %v291_v16  ;;  %1017 = vmatprep.mubr.msk.f32.mxu0 %vm302_vm0, %v284_v17 }
  0x22   : > { %1029 = vmatprep.mubr.msk.f32.mxu1 %vm302_vm0, %v292_v18  ;;  %p1097_p13 = pneg %p1096_p12 }
  0x24   : > { %1018 = vmatmul.mubr.msk.f32.gmra.mrb[4].mxu0 %vm302_vm0, %v285_v19  ;;  %p1104_p3 = pnand %p1103_p2, %p1097_p13 }
  0x25   : > { %1030 = vmatmul.mubr.msk.f32.gmra.mrb[4].mxu1 %vm302_vm0, %v293_v20  ;;  %1020 = vmatprep.mubr.msk.f32.mxu0 %vm302_vm0, %v286_v21 }
  0x26   : > { %1032 = vmatprep.mubr.msk.f32.mxu1 %vm302_vm0, %v294_v22 }
  0x28   : > { %1021 = vmatmul.mubr.msk.f32.gmra.mrb[6].mxu0 %vm302_vm0, %v287_v23 }
  0x29   : > { %1033 = vmatmul.mubr.msk.f32.gmra.mrb[6].mxu1 %vm302_vm0, %v295_v24 }
  0xef   : > { %v1013_v26 = vpop.f32.mrb[0].mxu0 }
  0xf0   : > { %v1025_v27 = vpop.f32.mrb[0].mxu1  ;;  %v417_v28 = vpop.f32.mrb[1].mxu0  ;;  %v504_v31 = vmul.f32 %v1013_v26, %v1309_v25  ;;  %v576_v37 = vmul.f32 %v1013_v26, %v1316_v34 }
  0xf1   : > { %v457_v29 = vpop.f32.mrb[1].mxu1  ;;  %v512_v30 = vmul.f32 %v1025_v27, %v1309_v25  ;;  %v933_v32 = vpack.c.bf16 %v1013_v26, %v417_v28  ;;  %v503_v38 = vmul.f32 %v1309_v25, %v417_v28  ;;  %v584_v45 = vmul.f32 %v1025_v27, %v1316_v34 }
  0xf2   : > { %v953_v33 = vpack.c.bf16 %v1025_v27, %v457_v29  ;;  %521 = vadd.xlane.f32.xlu0 %v504_v31  ;;  %v511_v46 = vmul.f32 %v1309_v25, %v457_v29  ;;  %v575_v54 = vmul.f32 %v1316_v34, %v417_v28  ;;  %v583_v60 = vmul.f32 %v1316_v34, %v457_v29 }
  0xf3   : > { %537 = vadd.xlane.f32.xlu1 %v512_v30  ;;  %934 = vst [vmem:[%s1318_s17] sm:$0xff] %v933_v32   ;;  %v1016_v35 = vpop.f32.mrb[2].mxu0 }
  0xf4   : > { %973 = vst [vmem:[%s1318_s17 + $0x20] sm:$0xff] %v953_v33   ;;  %v1028_v36 = vpop.f32.mrb[2].mxu1  ;;  %v427_v39 = vpop.f32.mrb[3].mxu0  ;;  %v506_v51 = vmul.f32 %v1016_v35, %v1309_v25  ;;  %v578_v62 = vmul.f32 %v1016_v35, %v1316_v34 }
  0xf5   : > { %v467_v40 = vpop.f32.mrb[3].mxu1  ;;  %v938_v41 = vpack.c.bf16 %v1016_v35, %v427_v39  ;;  %v514_v59 = vmul.f32 %v1028_v36, %v1309_v25  ;;  %v586_v63 = vmul.f32 %v1028_v36, %v1316_v34  ;;  %v577_v0 = vmul.f32 %v1316_v34, %v427_v39 }
  0xf6   : > { %v958_v42 = vpack.c.bf16 %v1028_v36, %v467_v40  ;;  %519 = vadd.xlane.f32.xlu0 %v503_v38  ;;  %v513_v61 = vmul.f32 %v1309_v25, %v467_v40  ;;  %v585_v1 = vmul.f32 %v1316_v34, %v467_v40  ;;  %v505_v2 = vmul.f32 %v1309_v25, %v427_v39 }
  0xf7   : > { %593 = vadd.xlane.f32.xlu1 %v576_v37  ;;  %970 = vst [vmem:[%s1318_s17 + $0x8] sm:$0xff] %v938_v41   ;;  %v1019_v43 = vpop.f32.mrb[4].mxu0 }
  0xf8   : > { %974 = vst [vmem:[%s1318_s17 + $0x28] sm:$0xff] %v958_v42   ;;  %v1031_v44 = vpop.f32.mrb[4].mxu1  ;;  %v437_v47 = vpop.f32.mrb[5].mxu0  ;;  %v508_v3 = vmul.f32 %v1019_v43, %v1309_v25  ;;  %v580_v7 = vmul.f32 %v1019_v43, %v1316_v34 }
  0xf9   : > { %v477_v48 = vpop.f32.mrb[5].mxu1  ;;  %v943_v49 = vpack.c.bf16 %v1019_v43, %v437_v47  ;;  %v507_v4 = vmul.f32 %v1309_v25, %v437_v47  ;;  %v516_v5 = vmul.f32 %v1031_v44, %v1309_v25  ;;  %v579_v8 = vmul.f32 %v1316_v34, %v437_v47 }
  0xfa   : > { %v963_v50 = vpack.c.bf16 %v1031_v44, %v477_v48  ;;  %535 = vadd.xlane.f32.xlu0 %v511_v46  ;;  %v515_v6 = vmul.f32 %v1309_v25, %v477_v48  ;;  %v588_v9 = vmul.f32 %v1031_v44, %v1316_v34  ;;  %v587_v10 = vmul.f32 %v1316_v34, %v477_v48 }
  0xfb   : > { %609 = vadd.xlane.f32.xlu1 %v584_v45  ;;  %971 = vst [vmem:[%s1318_s17 + $0x10] sm:$0xff] %v943_v49   ;;  %v1022_v52 = vpop.f32.mrb[6].mxu0 }
  0xfc   : > { %975 = vst [vmem:[%s1318_s17 + $0x30] sm:$0xff] %v963_v50   ;;  %v1034_v53 = vpop.f32.mrb[6].mxu1  ;;  %v447_v55 = vpop.f32.mrb[7].mxu0  ;;  %v510_v11 = vmul.f32 %v1022_v52, %v1309_v25  ;;  %v582_v15 = vmul.f32 %v1022_v52, %v1316_v34 }
  0xfd   : > { %v487_v56 = vpop.f32.mrb[7].mxu1  ;;  %v948_v57 = vpack.c.bf16 %v1022_v52, %v447_v55  ;;  %v509_v12 = vmul.f32 %v1309_v25, %v447_v55  ;;  %v518_v13 = vmul.f32 %v1034_v53, %v1309_v25  ;;  %v581_v16 = vmul.f32 %v1316_v34, %v447_v55 }
  0xfe   : > { %v968_v58 = vpack.c.bf16 %v1034_v53, %v487_v56  ;;  %591 = vadd.xlane.f32.xlu0 %v575_v54  ;;  %v517_v14 = vmul.f32 %v1309_v25, %v487_v56  ;;  %v590_v17 = vmul.f32 %v1034_v53, %v1316_v34  ;;  %v589_v18 = vmul.f32 %v1316_v34, %v487_v56 }
  0xff   : > { %525 = vadd.xlane.f32.xlu1 %v506_v51  ;;  %972 = vst [vmem:[%s1318_s17 + $0x18] sm:$0xff] %v948_v57  }
 0x100   : > { %976 = vst [vmem:[%s1318_s17 + $0x38] sm:$0xff] %v968_v58  }
 0x102   : > { %607 = vadd.xlane.f32.xlu0 %v583_v60 }
 0x103   : > { %541 = vadd.xlane.f32.xlu1 %v514_v59 }
 0x106   : > { %539 = vadd.xlane.f32.xlu0 %v513_v61 }
 0x107   : > { %597 = vadd.xlane.f32.xlu1 %v578_v62 }
 0x10a   : > { %595 = vadd.xlane.f32.xlu0 %v577_v0 }
 0x10b   : > { %613 = vadd.xlane.f32.xlu1 %v586_v63 }
 0x10e   : > { %611 = vadd.xlane.f32.xlu0 %v585_v1 }
 0x10f   : > { %523 = vadd.xlane.f32.xlu1 %v505_v2 }
 0x112   : > { %527 = vadd.xlane.f32.xlu0 %v507_v4 }
 0x113   : > { %529 = vadd.xlane.f32.xlu1 %v508_v3 }
 0x116   : > { %543 = vadd.xlane.f32.xlu0 %v515_v6 }
 0x117   : > { %545 = vadd.xlane.f32.xlu1 %v516_v5 }
 0x11a   : > { %599 = vadd.xlane.f32.xlu0 %v579_v8 }
 0x11b   : > { %601 = vadd.xlane.f32.xlu1 %v580_v7 }
 0x11e   : > { %615 = vadd.xlane.f32.xlu0 %v587_v10 }
 0x11f   : > { %617 = vadd.xlane.f32.xlu1 %v588_v9 }
 0x122   : > { %531 = vadd.xlane.f32.xlu0 %v509_v12 }
 0x123   : > { %533 = vadd.xlane.f32.xlu1 %v510_v11 }
 0x126   : > { %547 = vadd.xlane.f32.xlu0 %v517_v14 }
 0x127   : > { %549 = vadd.xlane.f32.xlu1 %v518_v13 }
 0x12a   : > { %603 = vadd.xlane.f32.xlu0 %v581_v16 }
 0x12b   : > { %605 = vadd.xlane.f32.xlu1 %v582_v15 }
 0x12e   : > { %619 = vadd.xlane.f32.xlu0 %v589_v18 }
 0x12f   : > { %621 = vadd.xlane.f32.xlu1 %v590_v17 }
 0x130   : > { %1107 = shalt.err (!%p1104_p3)
}
 0x131   : > { %s1108_s11 = scalar_lea.hbm %s1363_s29, 1024  ;;  %s1112_s16 = scalar_lea.hbm %s1490_s4, 3072 }
 0x132   : > { %p1109_p4 = scmp.ne.s32.totalorder %s1363_s29, %s1108_s11  ;;  %p1113_p9 = scmp.lt.u32.totalorder %s1363_s29, %s1490_s4 }
 0x133   : > { %p1114_p10 = scmp.lt.u32.totalorder %s1112_s16, %s1108_s11  ;;  %p1116_p12 = scmp.lt.u32.totalorder %s1108_s11, %s1363_s29 }
 0x134   : > { %p1110_p7 = pnand %p1109_p4, %p1234_p5 }
 0x135   : > { %p1115_p11 = por %p1114_p10, %p1113_p9 }
 0x136   : > { %p1111_p8 = pneg %p1110_p7 }
 0x137   : > { %p1117_p13 = por %p1116_p12, %p1115_p11 }
 0x139   : > { %p1118_p0 = pnand %p1117_p13, %p1111_p8 }
 0x13b   : > { %1121 = shalt.err (!%p1118_p0)
}
 0x13c   : > { %s1159_s20 = smov 64   ;;  %s1160_s26 = smov 4   ;;  %vm551_vm1 = vcmask 7168  }
 0x13d   : > { %1053 = dma.vmem_to_hbm [thread:$0]  (%p1234_p5), %s1365_s19, 1024, %s1363_s29, %s1369_s9, %s1159_s20, %s1159_s20, %s1160_s26  }
 0x13e   : > { %s1397_s12 = scalar_lea.vmem %s1491_s5, %s1263_s28  ;;  %s1407_s19 = scalar_lea.vmem %s1492_s6, %s1263_s28 }
 0x17f   : > { %v522_v20 = vpop.xlane.xlu0 %521 }
 0x180   : > { %v538_v19 = vpop.xlane.xlu1 %537  ;;  %553 = vst.msk [vmem:[%s1397_s12 + $0x8] sm:$0xff] %vm551_vm1, %v522_v20 }
 0x181   : > { %561 = vst.msk [vmem:[%s1397_s12 + $0x48] sm:$0xff] %vm551_vm1, %v538_v19 }
 0x183   : > { %v520_v22 = vpop.xlane.xlu0 %519 }
 0x184   : > { %v594_v21 = vpop.xlane.xlu1 %593  ;;  %552 = vst.msk [vmem:[%s1397_s12] sm:$0xff] %vm551_vm1, %v520_v22 }
 0x185   : > { %624 = vst.msk [vmem:[%s1407_s19 + $0x8] sm:$0xff] %vm551_vm1, %v594_v21 }
 0x187   : > { %v536_v24 = vpop.xlane.xlu0 %535 }
 0x188   : > { %v610_v23 = vpop.xlane.xlu1 %609  ;;  %560 = vst.msk [vmem:[%s1397_s12 + $0x40] sm:$0xff] %vm551_vm1, %v536_v24 }
 0x189   : > { %632 = vst.msk [vmem:[%s1407_s19 + $0x48] sm:$0xff] %vm551_vm1, %v610_v23 }
 0x18b   : > { %v592_v25 = vpop.xlane.xlu0 %591 }
 0x18c   : > { %v526_v26 = vpop.xlane.xlu1 %525  ;;  %623 = vst.msk [vmem:[%s1407_s19] sm:$0xff] %vm551_vm1, %v592_v25 }
 0x18d   : > { %555 = vst.msk [vmem:[%s1397_s12 + $0x18] sm:$0xff] %vm551_vm1, %v526_v26 }
 0x18f   : > { %v608_v27 = vpop.xlane.xlu0 %607 }
 0x190   : > { %v542_v28 = vpop.xlane.xlu1 %541  ;;  %631 = vst.msk [vmem:[%s1407_s19 + $0x40] sm:$0xff] %vm551_vm1, %v608_v27 }
 0x191   : > { %563 = vst.msk [vmem:[%s1397_s12 + $0x58] sm:$0xff] %vm551_vm1, %v542_v28 }
 0x193   : > { %v540_v29 = vpop.xlane.xlu0 %539 }
 0x194   : > { %v598_v30 = vpop.xlane.xlu1 %597  ;;  %562 = vst.msk [vmem:[%s1397_s12 + $0x50] sm:$0xff] %vm551_vm1, %v540_v29 }
 0x195   : > { %626 = vst.msk [vmem:[%s1407_s19 + $0x18] sm:$0xff] %vm551_vm1, %v598_v30 }
 0x197   : > { %v596_v32 = vpop.xlane.xlu0 %595 }
 0x198   : > { %v614_v31 = vpop.xlane.xlu1 %613  ;;  %625 = vst.msk [vmem:[%s1407_s19 + $0x10] sm:$0xff] %vm551_vm1, %v596_v32 }
 0x199   : > { %634 = vst.msk [vmem:[%s1407_s19 + $0x58] sm:$0xff] %vm551_vm1, %v614_v31 }
 0x19b   : > { %v612_v33 = vpop.xlane.xlu0 %611 }
 0x19c   : > { %v524_v34 = vpop.xlane.xlu1 %523  ;;  %633 = vst.msk [vmem:[%s1407_s19 + $0x50] sm:$0xff] %vm551_vm1, %v612_v33 }
 0x19d   : > { %554 = vst.msk [vmem:[%s1397_s12 + $0x10] sm:$0xff] %vm551_vm1, %v524_v34 }
 0x19f   : > { %v528_v36 = vpop.xlane.xlu0 %527 }
 0x1a0   : > { %v530_v35 = vpop.xlane.xlu1 %529  ;;  %556 = vst.msk [vmem:[%s1397_s12 + $0x20] sm:$0xff] %vm551_vm1, %v528_v36 }
 0x1a1   : > { %557 = vst.msk [vmem:[%s1397_s12 + $0x28] sm:$0xff] %vm551_vm1, %v530_v35 }
 0x1a3   : > { %v544_v38 = vpop.xlane.xlu0 %543 }
 0x1a4   : > { %v546_v37 = vpop.xlane.xlu1 %545  ;;  %564 = vst.msk [vmem:[%s1397_s12 + $0x60] sm:$0xff] %vm551_vm1, %v544_v38 }
 0x1a5   : > { %565 = vst.msk [vmem:[%s1397_s12 + $0x68] sm:$0xff] %vm551_vm1, %v546_v37 }
 0x1a7   : > { %v600_v40 = vpop.xlane.xlu0 %599 }
 0x1a8   : > { %v602_v39 = vpop.xlane.xlu1 %601  ;;  %627 = vst.msk [vmem:[%s1407_s19 + $0x20] sm:$0xff] %vm551_vm1, %v600_v40 }
 0x1a9   : > { %628 = vst.msk [vmem:[%s1407_s19 + $0x28] sm:$0xff] %vm551_vm1, %v602_v39 }
 0x1ab   : > { %v616_v42 = vpop.xlane.xlu0 %615 }
 0x1ac   : > { %v618_v41 = vpop.xlane.xlu1 %617  ;;  %635 = vst.msk [vmem:[%s1407_s19 + $0x60] sm:$0xff] %vm551_vm1, %v616_v42 }
 0x1ad   : > { %636 = vst.msk [vmem:[%s1407_s19 + $0x68] sm:$0xff] %vm551_vm1, %v618_v41 }
 0x1af   : > { %v532_v44 = vpop.xlane.xlu0 %531 }
 0x1b0   : > { %v534_v43 = vpop.xlane.xlu1 %533  ;;  %558 = vst.msk [vmem:[%s1397_s12 + $0x30] sm:$0xff] %vm551_vm1, %v532_v44 }
 0x1b1   : > { %559 = vst.msk [vmem:[%s1397_s12 + $0x38] sm:$0xff] %vm551_vm1, %v534_v43 }
 0x1b3   : > { %v548_v46 = vpop.xlane.xlu0 %547 }
 0x1b4   : > { %v550_v45 = vpop.xlane.xlu1 %549  ;;  %566 = vst.msk [vmem:[%s1397_s12 + $0x70] sm:$0xff] %vm551_vm1, %v548_v46 }
 0x1b5   : > { %567 = vst.msk [vmem:[%s1397_s12 + $0x78] sm:$0xff] %vm551_vm1, %v550_v45 }
 0x1b7   : > { %v604_v48 = vpop.xlane.xlu0 %603 }
 0x1b8   : > { %v606_v47 = vpop.xlane.xlu1 %605  ;;  %629 = vst.msk [vmem:[%s1407_s19 + $0x30] sm:$0xff] %vm551_vm1, %v604_v48 }
 0x1b9   : > { %630 = vst.msk [vmem:[%s1407_s19 + $0x38] sm:$0xff] %vm551_vm1, %v606_v47 }
 0x1bb   : > { %v620_v50 = vpop.xlane.xlu0 %619 }
 0x1bc   : > { %v622_v49 = vpop.xlane.xlu1 %621  ;;  %637 = vst.msk [vmem:[%s1407_s19 + $0x70] sm:$0xff] %vm551_vm1, %v620_v50 }
 0x1bd   : > { %638 = vst.msk [vmem:[%s1407_s19 + $0x78] sm:$0xff] %vm551_vm1, %v622_v49 }
 0x1be PF: > { %p1059_p5 = scmp.ge.s32.totalorder %s1156_s24, 2  ;;  %s766_s28 = sand.u32 1, %s1144_s21  }
 0x1bf   : > { %s767_s29 = scalar_lea.sflag [#allocation3], %s766_s28 }
 0x1c0   : > { %p1056_p1 = pnand %p1059_p5, %p1238_p6 }
 0x1c2   : > { %1139 = dma.done.wait (!%p1056_p1), %s767_s29, 1024  }
 0x1c3   : > { %1141 = vsyncadd (!%p1056_p1), %s767_s29, 4294966272  ;;  %p17_p2 = scmp.ge.s32.totalorder %s1221_s27, 5   ;;  %s1495_s21 = smov %s1148_s22 }
 0x1c4   : > { %s1496_s22 = smov %s1152_s23  ;;  %s1497_s23 = smov %s1232_s30 }
 0x1c5   : > { %s1498_s24 = smov %s1221_s27  ;;  %19 = sbr.rel (!%p17_p2) target bundleno = 3 (0x3), region = 95 }
 0x1cc   :  { %788 = vsyncpa [#allocation3], 1 }
 0x1cd   :  { %790 = vsyncpa [#allocation3 + $0x1], 1 }

</bundles_post_ra>
